<compile_context>
chip_gen: v5e
topology: v5e:2x2
jax: 0.10.0
libtpu: 0.0.40
codegen_flags: <defaults>
</compile_context>

<pallas_src>
import jax
import jax.numpy as jnp
from jax.experimental import pallas as pl
from jax.experimental.pallas import tpu as pltpu


def _zero_embed_kernel(x_ref, o_ref):
    # y = x * 0  (kept as a real multiply so NaN/Inf propagation matches torch)
    o_ref[...] = x_ref[...] * jnp.zeros((), dtype=x_ref.dtype)


_LANE = 128
_TARGET_TILE_BYTES = 1 << 20  # ~1 MiB per tile buffer: good HBM pipelining, small VMEM footprint


def _lane_dense_layout(n: int, last_dim: int):
    """Pick a 2-D [rows, cols] view of the flattened array with a dense lane axis."""
    if n >= _LANE and n % _LANE == 0:
        return n // _LANE, _LANE
    if last_dim > 0 and n % last_dim == 0:
        return n // last_dim, last_dim
    return 1, n


def zero_embedding(x: jax.Array) -> jax.Array:
    """Pallas equivalent of ZeroEmbedding.forward: x.unsqueeze(-1) * 0."""
    orig_shape = x.shape
    n = x.size
    if n == 0:
        return jnp.zeros(orig_shape + (1,), dtype=x.dtype)

    last_dim = orig_shape[-1] if x.ndim >= 1 else 1
    rows, cols = _lane_dense_layout(n, last_dim)
    x2d = x.reshape(rows, cols)

    itemsize = jnp.dtype(x.dtype).itemsize
    # Sublane-aligned row tile (~1 MiB per buffer).  Multiple of 32 covers
    # f32 (8), bf16 (16) and int8/fp8 (32) sublane packing.  With in+out
    # double-buffering this stays ~4 MiB of VMEM: safe on v5e/v6e/v7x defaults.
    tm = max(32, (_TARGET_TILE_BYTES // max(cols * itemsize, 1)) // 32 * 32)
    tm = min(tm, rows)  # tm == rows (full dim) is always a legal block shape

    grid = (pl.cdiv(rows, tm),)

    out2d = pl.pallas_call(
        _zero_embed_kernel,
        out_shape=jax.ShapeDtypeStruct((rows, cols), x.dtype),
        grid=grid,
        in_specs=[pl.BlockSpec((tm, cols), lambda i: (i, 0))],
        out_specs=pl.BlockSpec((tm, cols), lambda i: (i, 0)),
        compiler_params=pltpu.CompilerParams(
            dimension_semantics=("parallel",),  # row tiles are independent -> megacore on v7x
        ),
    )(x2d)

    # unsqueeze(-1): pure reshape glue (never give the out_spec a last dim of 1)
    return out2d.reshape(orig_shape + (1,))


if __name__ == "__main__":
    key = jax.random.PRNGKey(0)
    x = jax.random.normal(key, (2, 4, 16, 16), dtype=jnp.float32)

    y = zero_embedding(x)
    jax.block_until_ready(y)

    # sanity checks vs PyTorch semantics: x.unsqueeze(-1) * 0
    assert y.shape == (2, 4, 16, 16, 1), y.shape
    assert y.dtype == x.dtype, y.dtype
    assert bool(jnp.all(y == 0.0))

    # NaN propagation must match torch: NaN * 0 = NaN
    x_nan = x.at[1, 2, 3, 4].set(jnp.nan)
    y_nan = zero_embedding(x_nan)
    jax.block_until_ready(y_nan)
    assert bool(jnp.isnan(y_nan[1, 2, 3, 4, 0]))
    assert bool(jnp.all(jnp.where(jnp.isnan(x_nan)[..., None], True, y_nan == 0.0)))

    # larger shape exercises the row-tiled grid (multiple tiles + partial last tile)
    x_big = jax.random.normal(jax.random.PRNGKey(1), (3, 5000, 128), dtype=jnp.bfloat16)
    y_big = zero_embedding(x_big)
    jax.block_until_ready(y_big)
    assert y_big.shape == (3, 5000, 128, 1)
    assert bool(jnp.all(y_big == 0))

    print("KERNEL_OK")
</pallas_src>

<mosaic_0001>
module attributes {stable_mosaic.version = 11 : i64} {
  func.func @_zero_embed_kernel(%arg0: i32, %arg1: memref<16x128xf32, #tpu.memory_space<vmem>>, %arg2: memref<16x128xf32, #tpu.memory_space<vmem>>) attributes {dimension_semantics = [#tpu.dimension_semantics<parallel>], iteration_bounds = array<i64: 1>, scalar_prefetch = 0 : i64, scratch_operands = 0 : i64, tpu.core_type = #tpu.core_type<tc>, window_params = [{transform_indices = @transform_0, window_bounds = array<i64: 16, 128>}, {transform_indices = @transform_1, window_bounds = array<i64: 16, 128>}]} {
    %c0 = arith.constant 0 : index
    %c0_0 = arith.constant 0 : index
    %0 = vector.load %arg1[%c0, %c0_0] : memref<16x128xf32, #tpu.memory_space<vmem>>, vector<16x128xf32>
    %cst = arith.constant 0.000000e+00 : f32
    %1 = vector.broadcast %cst : f32 to vector<16x128xf32>
    %2 = arith.mulf %0, %1 : vector<16x128xf32>
    %c0_1 = arith.constant 0 : index
    %c0_2 = arith.constant 0 : index
    %3 = vector.load %arg2[%c0_1, %c0_2] : memref<16x128xf32, #tpu.memory_space<vmem>>, vector<16x128xf32>
    tpu.vector_store %arg2[%c0_1, %c0_2], %2 {strides = array<i32>} : memref<16x128xf32, #tpu.memory_space<vmem>>, vector<16x128xf32>,
    return
  }
  func.func @transform_0(%arg0: i32) -> (i32, i32) {
    %c0_i32 = arith.constant 0 : i32
    %c0_i32_0 = arith.constant 0 : i32
    return %arg0, %c0_i32 : i32, i32
  }
  func.func @transform_1(%arg0: i32) -> (i32, i32) {
    %c0_i32 = arith.constant 0 : i32
    %c0_i32_0 = arith.constant 0 : i32
    return %arg0, %c0_i32 : i32, i32
  }
}

</mosaic_0001>

<bundles_post_ra>
// kernel: tpu_custom_call.1
= control target key start
LH: loop header
LB: loop body
LE: loop exit
PB: predicated region body
PF: predicated region fallthrough
CT: control target
= control target key end

     0   :  { %6 = vsyncpa [#allocation3], 0  ;;  %s126_s0 = inlined_call_operand.hbm [shape: f32[16,128], index: 0, kind: input, shape index: {}]   ;;  %s127_s1 = inlined_call_operand.hbm [shape: f32[16,128], index: 1, kind: output, shape index: {}]  }
   0x1   :  { %7 = vsyncpa [#allocation4], 0  ;;  %s12_s8 = sshll.u32 %s126_s0, 4  ;;  %s106_s9 = smov [#allocation2]   ;;  %s13_s8 = int_to_ptr.hbm [resolvable:$true] %s12_s8 }
   0x2   :  { %s14_s10 = sshll.u32 %s106_s9, 4  ;;  %s107_s11 = smov 128   ;;  %s15_s10 = int_to_ptr.vmem [resolvable:$true] %s14_s10 }
   0x3   :  { %s108_s12 = smov 8  }
   0x4   :  { %20 = dma.hbm_to_vmem [thread:$0]  %s13_s8, 256, %s15_s10, [#allocation3], %s107_s11, %s107_s11, %s108_s12  }
   0x5   :  { %102 = dma.done.wait [#allocation3], 256  }
   0x6   :  { %103 = vsyncadd [#allocation3], 4294967040  ;;  %s109_s13 = smov [#allocation5]   ;;  %s37_s17 = sshll.u32 %s127_s1, 4  ;;  %v25_v0 = vld [vmem:[#allocation2] sm:$0xff]  ;;  %v26_v1 = vld [vmem:[#allocation2 + $0x8] sm:$0xff]  ;;  %s38_s17 = int_to_ptr.hbm [resolvable:$true] %s37_s17 }
   0x7   :  { %s35_s14 = sshll.u32 %s109_s13, 4  ;;  %v27_v2 = vmul.f32 0.0, %v25_v0  ;;  %v28_v3 = vmul.f32 0.0, %v26_v1  ;;  %s36_s14 = int_to_ptr.vmem [resolvable:$true] %s35_s14 }
   0x9   :  { %29 = vst [vmem:[#allocation5] sm:$0xff] %v27_v2 }
   0xa   :  { %30 = vst [vmem:[#allocation5 + $0x8] sm:$0xff] %v28_v3 }
   0xb   :  { %43 = dma.vmem_to_hbm [thread:$0]  %s36_s14, 256, %s38_s17, [#allocation4], %s107_s11, %s107_s11, %s108_s12  }
   0xc   :  { %104 = dma.done.wait [#allocation4], 256  }
   0xd   :  { %105 = vsyncadd [#allocation4], 4294967040 }
   0xe   :  { %48 = vsyncpa [#allocation3], 1 }
   0xf   :  { %49 = vsyncpa [#allocation4], 1 }

</bundles_post_ra>
